<compile_context>
chip_gen: v7x
topology: tpu7x:2x2x1
jax: 0.10.0
libtpu: 0.0.40
codegen_flags: <defaults>
</compile_context>

<pallas_src>
import math

import jax
import jax.numpy as jnp
from jax.experimental import pallas as pl
from jax.experimental.pallas import tpu as pltpu


# -----------------------------------------------------------------------------
# Kernel body (shared by both tiling paths).
#   path A: x_ref (bB, tT, D),  pe_ref (tT, D)
#   path B: x_ref (bB, 1, fT),  pe_ref (1, fT)
# pe broadcasts over the leading (batch-block) axis; add is in the native dtype.
# -----------------------------------------------------------------------------
def _add_pos_emb_kernel(x_ref, pe_ref, o_ref):
    o_ref[...] = (x_ref[...] + pe_ref[...]).astype(o_ref.dtype)


def make_sincos_pe(d_model, max_len, cls_token=False, dtype=jnp.float32):
    """Equivalent of SinCosPositionalEmbedding1d.__init__ (the registered buffer)."""
    assert d_model % 2 == 0
    position = jnp.arange(max_len, dtype=jnp.float32)[:, None]            # (L, 1)
    div_term = jnp.exp(jnp.arange(0.0, d_model, 2.0, dtype=jnp.float32)
                       * (-math.log(10000.0) / d_model))                  # (D/2,)
    angles = position * div_term                                          # (L, D/2)
    pe = jnp.zeros((max_len, d_model), jnp.float32)
    pe = pe.at[:, 0::2].set(jnp.sin(angles))
    pe = pe.at[:, 1::2].set(jnp.cos(angles))
    if cls_token:
        pe = jnp.concatenate([jnp.zeros((1, d_model), jnp.float32), pe], axis=0)
    return pe.astype(dtype)


def _vmem_capacity_bytes():
    """Physical VMEM of the attached TPU; conservative (v7x) fallback if unknown."""
    try:
        info = pltpu.get_tpu_info()
        cap = getattr(info, "vmem_capacity_bytes", None)
        if cap:
            return int(cap)
    except Exception:
        pass
    return 64 << 20   # v7x-safe fallback


def _pick_tiles(n_rows, batch, row_bytes, row_quantum, budget_bytes):
    """Largest (row_tile, batch_tile) such that the double-buffered blocks fit.

    VMEM cost model (bytes):  4 * bB * tR * row_bytes   (x in + out, 2 buffers each)
                            + 2 * tR * row_bytes        (pe tile, 2 buffers)
    tR is either the full n_rows or a multiple of row_quantum; bB then grows to
    use the remaining budget (batch blocking amortizes per-step overhead when
    tR*row_bytes is small).
    """
    max_rows = budget_bytes // (6 * row_bytes)
    max_rows = max(row_quantum, (max_rows // row_quantum) * row_quantum)
    tR = n_rows if n_rows <= max_rows else max_rows
    rem = budget_bytes - 2 * tR * row_bytes
    bB = int(max(1, min(batch, rem // (4 * tR * row_bytes))))
    return int(tR), bB


def sincos_positional_embedding_1d(x, pe, *, donate_x=False):
    """forward: x (B, T, D) -> x + pe[:T].  pe: (max_len[+1], D) buffer."""
    B, T, D = x.shape
    assert pe.shape[0] >= T and pe.shape[1] == D

    itemsize = jnp.dtype(x.dtype).itemsize
    # Pre-cast pe once so the in-kernel add is native dtype (halves pe traffic
    # and VMEM for bf16; no-op for fp32).  Exact for the fp32 path.
    pe = pe if pe.dtype == x.dtype else pe.astype(x.dtype)

    vmem_cap = _vmem_capacity_bytes()
    # ~45 MiB of blocks on v7x (64 MiB VMEM), ~90 MiB on v5e/v6e (128 MiB VMEM).
    budget = max(8 << 20, int(0.70 * vmem_cap))

    lane_dense = (D % 128 == 0)
    if lane_dense:
        # ---- Path A: full D in lanes, tile T in sublanes, block the batch. ----
        tT, bB = _pick_tiles(T, B, D * itemsize, 8, budget)
        grid = (pl.cdiv(T, tT), pl.cdiv(B, bB))         # batch innermost -> pe reused
        x_op = x
        # Pass the full buffer (no per-call slice) when the tile divisibility
        # rule allows; otherwise slice so block == full array dims is legal.
        pe_op = pe if (tT % 8 == 0) else pe[:T]
        x_spec = pl.BlockSpec((bB, tT, D), lambda t, b: (b, t, 0))
        pe_spec = pl.BlockSpec((tT, D), lambda t, b: (t, 0))
        out_spec = pl.BlockSpec((bB, tT, D), lambda t, b: (b, t, 0))
        out_shape = jax.ShapeDtypeStruct((B, T, D), x.dtype)
        x_blk = bB * tT * D * itemsize
        pe_blk = tT * D * itemsize
    else:
        # ---- Path B: D not lane-dense (e.g. d_model < 128): flatten (T, D). ----
        # The add is index-agnostic, so operating on the flat (T*D) axis is exact
        # and gives unmasked, lane-dense vector stores.
        flatTD = T * D
        fT, bB = _pick_tiles(flatTD, B, itemsize, 128, budget)
        grid = (pl.cdiv(flatTD, fT), pl.cdiv(B, bB))    # batch innermost -> pe reused
        x_op = x.reshape(B, 1, flatTD)
        pe_op = pe[:T].reshape(1, flatTD)
        x_spec = pl.BlockSpec((bB, 1, fT), lambda f, b: (b, 0, f))
        pe_spec = pl.BlockSpec((1, fT), lambda f, b: (0, f))
        out_spec = pl.BlockSpec((bB, 1, fT), lambda f, b: (b, 0, f))
        out_shape = jax.ShapeDtypeStruct((B, 1, flatTD), x.dtype)
        x_blk = bB * fT * itemsize
        pe_blk = fT * itemsize

    # VMEM limit derived from the actual need (tile sizing already respected the
    # budget), never a hard clamp that could under-provision large d_model.
    need = 4 * x_blk + 2 * pe_blk
    vmem_limit = int(min(vmem_cap, max(need + (2 << 20), 16 << 20)))

    out = pl.pallas_call(
        _add_pos_emb_kernel,
        out_shape=out_shape,
        grid_spec=pltpu.PrefetchScalarGridSpec(
            num_scalar_prefetch=0,
            grid=grid,
            in_specs=[x_spec, pe_spec],
            out_specs=out_spec,
        ),
        compiler_params=pltpu.CompilerParams(
            dimension_semantics=("parallel", "parallel"),
            vmem_limit_bytes=vmem_limit),
        cost_estimate=pl.CostEstimate(
            flops=B * T * D,                       # one add per element
            transcendentals=0,                     # sin/cos precomputed in the buffer
            bytes_accessed=(2 * B * T * D + T * D) * itemsize),
        input_output_aliases=({0: 0} if donate_x else {}),
    )(x_op, pe_op)

    return out if lane_dense else out.reshape(B, T, D)


def sincos_positional_embedding_1d_ref(x, pe):
    return x + pe[: x.shape[1]].astype(x.dtype)[None]


if __name__ == "__main__":
    # Small shapes consistent with the module: batch=2, seq=8, d_model=32, max_len=16.
    B, T, d_model, max_len = 2, 8, 32, 16

    key = jax.random.PRNGKey(0)
    x = jax.random.normal(key, (B, T, d_model), dtype=jnp.float32)

    # Buffers built once at "init" (register_buffer equivalent).
    pe = make_sincos_pe(d_model, max_len, cls_token=False)
    pe_cls = make_sincos_pe(d_model, max_len, cls_token=True)

    # References computed up front.
    ref = sincos_positional_embedding_1d_ref(x, pe)
    ref_cls = sincos_positional_embedding_1d_ref(x, pe_cls)

    # d_model=32 exercises the flattened lane-dense path.
    out = jax.block_until_ready(sincos_positional_embedding_1d(x, pe))
    assert out.shape == (B, T, d_model)
    assert jnp.allclose(out, ref, atol=1e-6, rtol=1e-6), "mismatch vs reference"

    # cls_token=True buffer variant (forward is identical).
    out_cls = jax.block_until_ready(sincos_positional_embedding_1d(x, pe_cls))
    assert jnp.allclose(out_cls, ref_cls, atol=1e-6, rtol=1e-6), "cls mismatch"

    # Lane-dense (d_model % 128 == 0) path with batch blocking and T % 8 != 0.
    B2, T2, D2, L2 = 4, 20, 128, 32
    x2 = jax.random.normal(jax.random.PRNGKey(1), (B2, T2, D2), dtype=jnp.float32)
    pe2 = make_sincos_pe(D2, L2, cls_token=False)
    ref2 = sincos_positional_embedding_1d_ref(x2, pe2)
    out2 = jax.block_until_ready(sincos_positional_embedding_1d(x2, pe2))
    assert jnp.allclose(out2, ref2, atol=1e-6, rtol=1e-6), "lane-dense path mismatch"

    print("KERNEL_OK")
</pallas_src>

<mosaic_0001>
module attributes {stable_mosaic.version = 11 : i64} {
  func.func @_add_pos_emb_kernel(%arg0: i32, %arg1: i32, %arg2: memref<2x1x256xf32, #tpu.memory_space<vmem>>, %arg3: memref<1x256xf32, #tpu.memory_space<vmem>>, %arg4: memref<2x1x256xf32, #tpu.memory_space<vmem>>) attributes {dimension_semantics = [#tpu.dimension_semantics<parallel>, #tpu.dimension_semantics<parallel>], iteration_bounds = array<i64: 1, 1>, scalar_prefetch = 0 : i64, scratch_operands = 0 : i64, tpu.core_type = #tpu.core_type<tc>, window_params = [{transform_indices = @transform_0, window_bounds = array<i64: 2, 1, 256>}, {transform_indices = @transform_1, window_bounds = array<i64: 1, 256>}, {transform_indices = @transform_2, window_bounds = array<i64: 2, 1, 256>}]} {
    %c0 = arith.constant 0 : index
    %c0_0 = arith.constant 0 : index
    %c0_1 = arith.constant 0 : index
    %0 = vector.load %arg2[%c0, %c0_0, %c0_1] : memref<2x1x256xf32, #tpu.memory_space<vmem>>, vector<2x1x256xf32>
    %c0_2 = arith.constant 0 : index
    %c0_3 = arith.constant 0 : index
    %1 = vector.load %arg3[%c0_2, %c0_3] : memref<1x256xf32, #tpu.memory_space<vmem>>, vector<1x256xf32>
    %2 = vector.shape_cast %1 : vector<1x256xf32> to vector<1x1x256xf32>
    %3 = vector.broadcast %2 : vector<1x1x256xf32> to vector<2x1x256xf32>
    %4 = arith.addf %0, %3 : vector<2x1x256xf32>
    %c0_4 = arith.constant 0 : index
    %c0_5 = arith.constant 0 : index
    %c0_6 = arith.constant 0 : index
    %5 = vector.load %arg4[%c0_4, %c0_5, %c0_6] : memref<2x1x256xf32, #tpu.memory_space<vmem>>, vector<2x1x256xf32>
    tpu.vector_store %arg4[%c0_4, %c0_5, %c0_6], %4 {strides = array<i32>} : memref<2x1x256xf32, #tpu.memory_space<vmem>>, vector<2x1x256xf32>,
    return
  }
  func.func @transform_0(%arg0: i32, %arg1: i32) -> (i32, i32, i32) {
    %c0_i32 = arith.constant 0 : i32
    %c0_i32_0 = arith.constant 0 : i32
    return %arg1, %c0_i32, %arg0 : i32, i32, i32
  }
  func.func @transform_1(%arg0: i32, %arg1: i32) -> (i32, i32) {
    %c0_i32 = arith.constant 0 : i32
    %c0_i32_0 = arith.constant 0 : i32
    return %c0_i32, %arg0 : i32, i32
  }
  func.func @transform_2(%arg0: i32, %arg1: i32) -> (i32, i32, i32) {
    %c0_i32 = arith.constant 0 : i32
    %c0_i32_0 = arith.constant 0 : i32
    return %arg1, %c0_i32, %arg0 : i32, i32, i32
  }
}

</mosaic_0001>

<bundles_post_ra>
// kernel: tpu_custom_call.1
= control target key start
LH: loop header
LB: loop body
LE: loop exit
PB: predicated region body
PF: predicated region fallthrough
CT: control target
= control target key end

     0   :  { %7 = vsyncpa [#allocation3], 0  ;;  %s158_s0 = inlined_call_operand.hbm [shape: f32[2,1,256], index: 0, kind: input, shape index: {}]   ;;  %s159_s1 = inlined_call_operand.vmem [shape: f32[1,256], index: 1, kind: input, shape index: {}]   ;;  %s160_s2 = inlined_call_operand.hbm [shape: f32[2,1,256], index: 2, kind: output, shape index: {}]  }
   0x1   :  { %8 = vsyncpa [#allocation4], 0  ;;  %s106_s9 = smov [#allocation2]   ;;  %s58_s13 = scalar_lea.hbm %s158_s0, 64 }
   0x2   :  { %s14_s10 = sshll.u32 %s106_s9, 4  ;;  %p59_p0 = scmp.ne.s32.totalorder %s158_s0, %s58_s13  ;;  %s15_s10 = int_to_ptr.vmem [resolvable:$true] %s14_s10 }
   0x3   :  { %p62_p1 = scmp.lt.u32.totalorder %s58_s13, %s158_s0 }
   0x5   :  { %p64_p2 = pnand %p62_p1, %p59_p0 }
   0x7   :  { %67 = shalt.err (!%p64_p2)
}
   0x8   :  { %s68_s18 = scalar_lea.vmem %s15_s10, 64  ;;  %p73_p4 = scmp.lt.s32.totalorder %s15_s10, %s15_s10 }
   0x9   :  { %p69_p3 = scmp.ne.s32.totalorder %s15_s10, %s68_s18  ;;  %p74_p5 = scmp.lt.s32.totalorder %s68_s18, %s68_s18 }
   0xb   :  { %p75_p6 = por %p74_p5, %p73_p4 }
   0xd   :  { %p76_p7 = pnand %p75_p6, %p69_p3 }
   0xf   :  { %79 = shalt.err (!%p76_p7)
}
  0x10   :  { %s107_s19 = smov 32   ;;  %s108_s20 = smov 2  }
  0x11   :  { %20 = dma.hbm_to_vmem [thread:$0]  %s158_s0, 64, %s15_s10, [#allocation3], %s107_s19, %s107_s19, %s108_s20  }
  0x12   :  { %102 = dma.done.wait [#allocation3], 64  }
  0x13   :  { %103 = vsyncadd [#allocation3], 4294967232  ;;  %v31_v0 = vlaneseq  ;;  %s109_s23 = smov [#allocation5]   ;;  %v26_v1 = vld [vmem:[#allocation2] sm:$0x3] }
  0x14   :  { %s42_s24 = sshll.u32 %s109_s23, 4  ;;  %v28_v2 = vld [vmem:[%s159_s1] sm:$0x3]  ;;  %v27_v3 = vld [vmem:[#allocation2 + $0x2] sm:$0x3]  ;;  %s43_s24 = int_to_ptr.vmem [resolvable:$true] %s42_s24 }
  0x15   :  { %vm33_vm0 = vcmp.lt.s32.totalorder %v31_v0, 256  ;;  %v29_v4 = vadd.f32 %v28_v2, %v26_v1  ;;  %v30_v5 = vadd.f32 %v28_v2, %v27_v3  ;;  %s80_s27 = scalar_lea.vmem %s43_s24, 64  ;;  %p85_p9 = scmp.lt.s32.totalorder %s43_s24, %s43_s24 }
  0x16   :  { %p81_p8 = scmp.ne.s32.totalorder %s43_s24, %s80_s27  ;;  %p86_p10 = scmp.lt.s32.totalorder %s80_s27, %s80_s27 }
  0x17   :  { %35 = vst.msk [vmem:[#allocation5] sm:$0x3] %vm33_vm0, %v29_v4  ;;  %36 = vst.msk [vmem:[#allocation5 + $0x2] sm:$0x3] %vm33_vm0, %v30_v5 }
  0x18   :  { %p87_p11 = por %p86_p10, %p85_p9 }
  0x1a   :  { %p88_p12 = pnand %p87_p11, %p81_p8 }
  0x1c   :  { %91 = shalt.err (!%p88_p12)
}
  0x1d   :  { %s92_s29 = scalar_lea.hbm %s160_s2, 64 }
  0x1e   :  { %p93_p13 = scmp.ne.s32.totalorder %s160_s2, %s92_s29  ;;  %p96_p0 = scmp.lt.u32.totalorder %s92_s29, %s160_s2 }
  0x20   :  { %p98_p1 = pnand %p96_p0, %p93_p13 }
  0x22   :  { %101 = shalt.err (!%p98_p1)
}
  0x23   :  { %48 = dma.vmem_to_hbm [thread:$0]  %s43_s24, 64, %s160_s2, [#allocation4], %s107_s19, %s107_s19, %s108_s20  }
  0x24   :  { %104 = dma.done.wait [#allocation4], 64  }
  0x25   :  { %105 = vsyncadd [#allocation4], 4294967232 }
  0x26   :  { %52 = vsyncpa [#allocation3], 1 }
  0x27   :  { %53 = vsyncpa [#allocation4], 1 }

</bundles_post_ra>
